<compile_context>
chip_gen: v5e
topology: v5e:2x2
jax: 0.10.0
libtpu: 0.0.40
codegen_flags: <defaults>
</compile_context>

<pallas_src>
import functools
import math

import numpy as np

import jax
import jax.numpy as jnp
from jax import lax
from jax.experimental import pallas as pl
from jax.experimental.pallas import tpu as pltpu


def _round_up(a, m):
    return ((a + m - 1) // m) * m


def _round_down(a, m):
    return (a // m) * m


def _cdiv(a, b):
    return (a + b - 1) // b


# --------------------------------------------------------------------------
# Kernels
# --------------------------------------------------------------------------
def _gem_kernel(x_ref, o_ref, acc_ref, *, p, inv_p, eps, hw, rem, int_p,
                need_mask, bf16_compute):
    """Streaming path: one (row-tile, hw-tile) grid step.

    x_ref:   (tile_r, block_hw)   input block
    o_ref:   (tile_r, 1)          pooled output (written on last k step)
    acc_ref: (tile_r, 1) float32  running sum of clamp(x, eps)^p over H*W
    """
    k = pl.program_id(1)
    nk = pl.num_programs(1)

    @pl.when(k == 0)
    def _init():
        acc_ref[...] = jnp.zeros_like(acc_ref)

    x = x_ref[...]
    cdt = x.dtype if (bf16_compute and x.dtype == jnp.bfloat16) else jnp.float32
    x = x.astype(cdt)
    x = jnp.maximum(x, jnp.asarray(eps, cdt))     # clamp(min=eps) -> x > 0

    if int_p is not None:
        # Integer p fast path: VALU multiplies, keeps the EUP off the
        # critical path (pow would lower to exp+log per element).
        xp = x
        for _ in range(int_p - 1):
            xp = xp * x
    else:
        xp = jnp.exp(jnp.asarray(p, cdt) * jnp.log(x))   # x > 0, log is safe

    if need_mask:
        is_last = k == nk - 1

        @pl.when(jnp.logical_not(is_last))
        def _acc_full():
            acc_ref[...] += jnp.sum(xp, axis=-1, keepdims=True,
                                    dtype=jnp.float32)

        @pl.when(is_last)
        def _acc_masked():
            # Only the last hw block can be partial: zero out-of-range lanes
            # with a select so garbage/NaN never reaches the sum.
            col = lax.broadcasted_iota(jnp.int32, xp.shape, 1)
            xpm = jnp.where(col < rem, xp, jnp.zeros_like(xp))
            acc_ref[...] += jnp.sum(xpm, axis=-1, keepdims=True,
                                    dtype=jnp.float32)
    else:
        acc_ref[...] += jnp.sum(xp, axis=-1, keepdims=True, dtype=jnp.float32)

    @pl.when(k == nk - 1)
    def _finalize():
        mean = acc_ref[...] * (1.0 / hw)          # avg_pool2d over full H*W
        if inv_p == 1.0:
            out = mean
        elif inv_p == 0.5:
            out = jnp.sqrt(mean)
        else:
            out = jnp.exp(inv_p * jnp.log(mean))  # mean >= eps^p > 0
        o_ref[...] = out.astype(o_ref.dtype)


def _gem_packed_kernel(x_ref, ones_ref, o_ref, *, p, inv_p, eps, hw, int_p,
                       bf16_compute):
    """Lane-dense path for small / non-128-multiple hw.

    x_ref:    (tile_pr, G*hw)  packed rows (G original rows per packed row)
    ones_ref: (G*hw, G)        block-diagonal ones (segmented-sum matrix)
    o_ref:    (tile_pr, G)     pooled output, lane-dense
    """
    x = x_ref[...]
    cdt = x.dtype if (bf16_compute and x.dtype == jnp.bfloat16) else jnp.float32
    x = x.astype(cdt)
    x = jnp.maximum(x, jnp.asarray(eps, cdt))

    if int_p is not None:
        xp = x
        for _ in range(int_p - 1):
            xp = xp * x
    else:
        xp = jnp.exp(jnp.asarray(p, cdt) * jnp.log(x))
    xp = xp.astype(jnp.float32)

    # Segmented per-row spatial sum on the (otherwise idle) MXU.
    # HIGHEST precision keeps the f32 sum exact enough vs the f32 reference.
    s = lax.dot_general(xp, ones_ref[...],
                        dimension_numbers=(((1,), (0,)), ((), ())),
                        precision=lax.Precision.HIGHEST,
                        preferred_element_type=jnp.float32)   # (tile_pr, G)

    mean = s * (1.0 / hw)
    if inv_p == 1.0:
        out = mean
    elif inv_p == 0.5:
        out = jnp.sqrt(mean)
    else:
        out = jnp.exp(inv_p * jnp.log(mean))
    o_ref[...] = out.astype(o_ref.dtype)


# --------------------------------------------------------------------------
# Wrapper helpers
# --------------------------------------------------------------------------
def _vmem_budget_and_limit():
    """Generation-aware VMEM budget for live blocks + explicit scoped limit."""
    try:
        cap = int(pltpu.get_tpu_info().vmem_capacity_bytes)
    except Exception:
        cap = 64 * 1024 * 1024  # conservative: v7x has 64 MiB per TensorCore
    budget = max(8 << 20, min(cap // 2 - (8 << 20), 48 << 20))
    limit = max(32 << 20, min(cap - (4 << 20), 2 * budget))
    return budget, limit


def _num_tensorcores():
    """Best-effort count of TensorCores sharing a megacore grid (v7x/v4/v5p)."""
    try:
        kind = jax.devices()[0].device_kind.lower()
    except Exception:
        return 1
    if "v7" in kind or "v5p" in kind or "v4" in kind:
        return 2
    return 1


def _row_tiles(rows, tile_cap, ncores):
    """Pick (tile_r, num_r): largest tile under the budget, even step count
    on 2-TC chips, no forced split on single-TC chips."""
    tile_cap = max(8, _round_down(tile_cap, 8))
    if rows <= tile_cap:
        tile_r, num_r = rows, 1
    else:
        tile_r, num_r = tile_cap, _cdiv(rows, tile_cap)
    if ncores >= 2 and rows >= 16:
        if num_r == 1:
            t = max(8, _round_up(_cdiv(rows, 2), 8))
            tile_r, num_r = t, _cdiv(rows, t)
        elif num_r % 2 != 0:
            for cand in (num_r + 1, num_r + 3):
                t = max(8, _round_up(_cdiv(rows, cand), 8))
                nr = _cdiv(rows, t)
                if t <= tile_cap and nr % 2 == 0:
                    tile_r, num_r = t, nr
                    break
    return tile_r, num_r


# --------------------------------------------------------------------------
# Public entry point
# --------------------------------------------------------------------------
def gem_pallas(x, p=3.0, eps=1e-6, bf16_compute=False):
    """GeM pooling. x: (N, C, H, W) -> (N, C, 1, 1).

    bf16_compute: opt-in — keep clamp/pow in bf16 for bf16 inputs (v6e/v7x
    VALU/EUP support bf16); accumulation stays f32. Small accuracy tradeoff.
    """
    n, c, h, w = x.shape
    rows = n * c
    hw = h * w
    x2 = x.reshape(rows, hw)

    p_f = float(p)
    int_p = None
    if abs(p_f - round(p_f)) < 1e-12 and 1 <= int(round(p_f)) <= 16:
        int_p = int(round(p_f))
    inv_p = 1.0 / p_f

    in_bytes = x2.dtype.itemsize
    # Per-element live VMEM: double-buffered input + ~3 f32 full-tile temps
    # (upcast, pow chain, mask/select) so v7x's 64 MiB never spills.
    per_elem = 2 * in_bytes + 3 * 4
    budget, vmem_limit = _vmem_budget_and_limit()
    ncores = _num_tensorcores()

    flops_per_elem = (int_p + 1) if int_p is not None else 4

    # ---------------- lane-dense packed path (small / ragged hw) ----------
    if hw % 128 != 0:
        g = 128 // math.gcd(hw, 128)          # min rows per packed row
        phw = g * hw                          # packed lane dim (mult. of 128)
        ones_bytes = 2 * phw * g * 4          # resident ones matrix allowance
        fits = (8 * phw * per_elem + ones_bytes) <= budget
        if fits and rows % g == 0:
            packed_rows = rows // g
            x_packed = x2.reshape(packed_rows, phw)

            seg = np.repeat(np.arange(g), hw)
            ones_np = (seg[:, None] == np.arange(g)[None, :]).astype(np.float32)
            ones_mat = jnp.asarray(ones_np)   # (phw, g) block-diagonal ones

            tile_cap = (budget - ones_bytes) // (phw * per_elem)
            tile_pr, num_pr = _row_tiles(packed_rows, tile_cap, ncores)

            kernel = functools.partial(
                _gem_packed_kernel, p=p_f, inv_p=inv_p, eps=float(eps),
                hw=hw, int_p=int_p, bf16_compute=bf16_compute)

            cost = pl.CostEstimate(
                flops=rows * hw * flops_per_elem + 2 * rows * hw * g,
                transcendentals=(0 if int_p is not None else 2 * rows * hw)
                + 2 * rows,
                bytes_accessed=rows * hw * in_bytes + phw * g * 4
                + rows * in_bytes,
            )

            out_pk = pl.pallas_call(
                kernel,
                out_shape=jax.ShapeDtypeStruct((packed_rows, g), x.dtype),
                grid_spec=pltpu.PrefetchScalarGridSpec(
                    num_scalar_prefetch=0,
                    grid=(num_pr,),
                    in_specs=[
                        pl.BlockSpec((tile_pr, phw), lambda i: (i, 0)),
                        pl.BlockSpec((phw, g), lambda i: (0, 0)),
                    ],
                    out_specs=pl.BlockSpec((tile_pr, g), lambda i: (i, 0)),
                ),
                compiler_params=pltpu.CompilerParams(
                    dimension_semantics=("parallel",),
                    vmem_limit_bytes=vmem_limit,
                ),
                cost_estimate=cost,
            )(x_packed, ones_mat)

            return out_pk.reshape(rows)[:rows].reshape(n, c, 1, 1)
        # else: fall through to the streaming path (correct, less lane-dense).

    # ---------------- streaming path ---------------------------------------
    # reduction (H*W) axis tiling
    if 8 * _round_up(hw, 128) * per_elem <= budget:
        block_hw = hw                     # whole spatial axis in one block
        need_mask = False
        num_k = 1
        rem = hw
    else:
        cand = max(128, _round_down(budget // (8 * per_elem), 128))
        cand = min(cand, max(128, _round_down(hw, 128)))
        block_hw = cand
        # Prefer a multiple of 128 that exactly divides hw (no mask, no
        # wasted DMA) if one exists near the budget-derived size.
        b = cand
        lo = max(128, cand // 2)
        while b >= lo:
            if hw % b == 0:
                block_hw = b
                break
            b -= 128
        need_mask = (hw % block_hw) != 0
        num_k = _cdiv(hw, block_hw)
        rem = hw - (num_k - 1) * block_hw

    # row (N*C) axis tiling
    block_hw_pad = _round_up(block_hw, 128)
    tile_cap = budget // (block_hw_pad * per_elem)
    tile_r, num_r = _row_tiles(rows, tile_cap, ncores)

    kernel = functools.partial(
        _gem_kernel, p=p_f, inv_p=inv_p, eps=float(eps), hw=hw, rem=rem,
        int_p=int_p, need_mask=need_mask, bf16_compute=bf16_compute)

    cost = pl.CostEstimate(
        flops=rows * hw * flops_per_elem,
        transcendentals=(0 if int_p is not None else 2 * rows * hw) + 2 * rows,
        bytes_accessed=rows * hw * in_bytes + rows * in_bytes,
    )

    out2 = pl.pallas_call(
        kernel,
        out_shape=jax.ShapeDtypeStruct((rows, 1), x.dtype),
        grid_spec=pltpu.PrefetchScalarGridSpec(
            num_scalar_prefetch=0,
            grid=(num_r, num_k),
            in_specs=[pl.BlockSpec((tile_r, block_hw), lambda i, k: (i, k))],
            out_specs=pl.BlockSpec((tile_r, 1), lambda i, k: (i, 0)),
            scratch_shapes=[pltpu.VMEM((tile_r, 1), jnp.float32)],
        ),
        compiler_params=pltpu.CompilerParams(
            dimension_semantics=("parallel", "arbitrary"),
            vmem_limit_bytes=vmem_limit,
        ),
        cost_estimate=cost,
    )(x2)

    return out2.reshape(n, c, 1, 1)


class GeM:
    """JAX/Pallas port of the PyTorch GeM module (forward only)."""

    def __init__(self, p=3, eps=1e-6, p_trainable=False):
        if p_trainable:
            self.p = jnp.ones((1,), jnp.float32) * p
        else:
            self.p = p
        self.eps = eps

    def __call__(self, x):
        # TODO(synk): pallas_call defines no VJP and p is baked in as a static
        # scalar, so a trainable/traced p receives no gradient (forward
        # semantics match the PyTorch module exactly).
        p = self.p
        if isinstance(p, jnp.ndarray):
            p = float(jnp.reshape(p, (-1,))[0])
        return gem_pallas(x, p=float(p), eps=self.eps)


def _gem_ref(x, p=3.0, eps=1e-6):
    xc = jnp.maximum(x.astype(jnp.float32), eps) ** p
    return jnp.mean(xc, axis=(-2, -1), keepdims=True) ** (1.0 / p)


if __name__ == "__main__":
    key = jax.random.PRNGKey(0)
    k0, k1 = jax.random.split(key)

    # Primary shape (streaming path: hw = 256 is lane-aligned).
    x = jax.random.normal(k0, (2, 4, 16, 16), dtype=jnp.float32)
    mod = GeM(p=3, eps=1e-6, p_trainable=False)
    out = jax.block_until_ready(mod(x))
    ref = _gem_ref(x, p=3.0, eps=1e-6)
    assert out.shape == (2, 4, 1, 1), out.shape
    assert jnp.allclose(out, ref.astype(out.dtype), rtol=1e-4, atol=1e-5), (
        "mismatch vs reference (streaming path)"
    )

    # ResNet-style GeM shape (lane-dense packed path: hw = 49, G = 128).
    x2 = jax.random.normal(k1, (2, 512, 7, 7), dtype=jnp.float32)
    out2 = jax.block_until_ready(gem_pallas(x2, p=3.0, eps=1e-6))
    ref2 = _gem_ref(x2, p=3.0, eps=1e-6)
    assert out2.shape == (2, 512, 1, 1), out2.shape
    assert jnp.allclose(out2, ref2.astype(out2.dtype), rtol=1e-4, atol=1e-5), (
        "mismatch vs reference (packed path)"
    )

    print("KERNEL_OK")
</pallas_src>

<mosaic_0001>
module attributes {stable_mosaic.version = 11 : i64} {
  func.func @_gem_kernel(%arg0: i32, %arg1: i32, %arg2: memref<8x256xf32, #tpu.memory_space<vmem>>, %arg3: memref<8x1xf32, #tpu.memory_space<vmem>>, %arg4: memref<8x1xf32, #tpu.memory_space<vmem>>) attributes {dimension_semantics = [#tpu.dimension_semantics<parallel>, #tpu.dimension_semantics<arbitrary>], iteration_bounds = array<i64: 1, 1>, scalar_prefetch = 0 : i64, scratch_operands = 1 : i64, tpu.core_type = #tpu.core_type<tc>, window_params = [{transform_indices = @transform_0, window_bounds = array<i64: 8, 256>}, {transform_indices = @transform_1, window_bounds = array<i64: 8, 1>}]} {
    %c0_i32 = arith.constant 0 : i32
    %0 = arith.cmpi eq, %arg1, %c0_i32 : i32
    %1 = arith.extui %0 : i1 to i32
    %c0_i32_0 = arith.constant 0 : i32
    %2 = arith.cmpi ne, %1, %c0_i32_0 : i32
    scf.if %2 {
      %cst_9 = arith.constant 0.000000e+00 : f32
      %16 = vector.broadcast %cst_9 : f32 to vector<8x1xf32>
      %c0_10 = arith.constant 0 : index
      %c0_11 = arith.constant 0 : index
      %17 = vector.load %arg4[%c0_10, %c0_11] : memref<8x1xf32, #tpu.memory_space<vmem>>, vector<8x1xf32>
      tpu.vector_store %arg4[%c0_10, %c0_11], %16 {strides = array<i32>} : memref<8x1xf32, #tpu.memory_space<vmem>>, vector<8x1xf32>,
    } else {
    }
    %c0 = arith.constant 0 : index
    %c0_1 = arith.constant 0 : index
    %3 = vector.load %arg2[%c0, %c0_1] : memref<8x256xf32, #tpu.memory_space<vmem>>, vector<8x256xf32>
    %cst = arith.constant 9.99999997E-7 : f32
    %4 = vector.broadcast %cst : f32 to vector<8x256xf32>
    %5 = arith.maximumf %3, %4 : vector<8x256xf32>
    %6 = arith.mulf %5, %5 : vector<8x256xf32>
    %7 = arith.mulf %6, %5 : vector<8x256xf32>
    %c0_2 = arith.constant 0 : index
    %c0_3 = arith.constant 0 : index
    %8 = vector.load %arg4[%c0_2, %c0_3] : memref<8x1xf32, #tpu.memory_space<vmem>>, vector<8x1xf32>
    %cst_4 = arith.constant dense<0.000000e+00> : vector<8xf32>
    %9 = vector.multi_reduction <add>, %7, %cst_4 [1] : vector<8x256xf32> to vector<8xf32>
    %10 = vector.shape_cast %9 : vector<8xf32> to vector<8x1xf32>
    %11 = arith.addf %8, %10 : vector<8x1xf32>
    %c0_5 = arith.constant 0 : index
    %c0_6 = arith.constant 0 : index
    %12 = vector.load %arg4[%c0_5, %c0_6] : memref<8x1xf32, #tpu.memory_space<vmem>>, vector<8x1xf32>
    tpu.vector_store %arg4[%c0_5, %c0_6], %11 {strides = array<i32>} : memref<8x1xf32, #tpu.memory_space<vmem>>, vector<8x1xf32>,
    %c0_i32_7 = arith.constant 0 : i32
    %13 = arith.cmpi eq, %arg1, %c0_i32_7 : i32
    %14 = arith.extui %13 : i1 to i32
    %c0_i32_8 = arith.constant 0 : i32
    %15 = arith.cmpi ne, %14, %c0_i32_8 : i32
    scf.if %15 {
      %c0_9 = arith.constant 0 : index
      %c0_10 = arith.constant 0 : index
      %16 = vector.load %arg4[%c0_9, %c0_10] : memref<8x1xf32, #tpu.memory_space<vmem>>, vector<8x1xf32>
      %cst_11 = arith.constant 3.906250e-03 : f32
      %17 = vector.broadcast %cst_11 : f32 to vector<8x1xf32>
      %18 = arith.mulf %16, %17 : vector<8x1xf32>
      %19 = math.log %18 : vector<8x1xf32>
      %cst_12 = arith.constant 0.333333343 : f32
      %20 = vector.broadcast %cst_12 : f32 to vector<8x1xf32>
      %21 = arith.mulf %20, %19 : vector<8x1xf32>
      %22 = math.exp %21 : vector<8x1xf32>
      %c0_13 = arith.constant 0 : index
      %c0_14 = arith.constant 0 : index
      %23 = vector.load %arg3[%c0_13, %c0_14] : memref<8x1xf32, #tpu.memory_space<vmem>>, vector<8x1xf32>
      tpu.vector_store %arg3[%c0_13, %c0_14], %22 {strides = array<i32>} : memref<8x1xf32, #tpu.memory_space<vmem>>, vector<8x1xf32>,
    } else {
    }
    return
  }
  func.func @transform_0(%arg0: i32, %arg1: i32) -> (i32, i32) {
    %c0_i32 = arith.constant 0 : i32
    return %arg0, %arg1 : i32, i32
  }
  func.func @transform_1(%arg0: i32, %arg1: i32) -> (i32, i32) {
    %c0_i32 = arith.constant 0 : i32
    %c0_i32_0 = arith.constant 0 : i32
    return %arg0, %c0_i32 : i32, i32
  }
}

</mosaic_0001>

<bundles_post_ra>
// kernel: tpu_custom_call.1
= control target key start
LH: loop header
LB: loop body
LE: loop exit
PB: predicated region body
PF: predicated region fallthrough
CT: control target
= control target key end

     0   :  { %6 = vsyncpa [#allocation4], 0  ;;  %s91_s9 = smov [#allocation3]   ;;  %s112_s0 = inlined_call_operand.hbm [shape: f32[8,256], index: 0, kind: input, shape index: {}]   ;;  %s113_s1 = inlined_call_operand.vmem [shape: f32[8,1], index: 1, kind: output, shape index: {}]  }
   0x1   :  { %s12_s8 = sshll.u32 %s112_s0, 4  ;;  %s14_s10 = sshll.u32 %s91_s9, 4  ;;  %s13_s8 = int_to_ptr.hbm [resolvable:$true] %s12_s8  ;;  %s15_s10 = int_to_ptr.vmem [resolvable:$true] %s14_s10 }
   0x2   :  { %17 = dma.hbm_to_vmem [thread:$0]  %s13_s8, 256, %s15_s10, [#allocation4]  }
   0x3   :  { %89 = dma.done.wait [#allocation4], 256  }
   0x4   :  { %90 = vsyncadd [#allocation4], 4294967040  ;;  %vm26_vm0 = vcmask 7168   ;;  %v92_v0 = vmov 0.0   ;;  %v28_v1 = vld [vmem:[#allocation3] sm:$0xff]  ;;  %v29_v2 = vld [vmem:[#allocation3 + $0x8] sm:$0xff] }
   0x5   :  { %27 = vst.msk [vmem:[#allocation2] sm:$0xff] %vm26_vm0, %v92_v0  ;;  %v30_v3 = vmax.f32 %v28_v1, 1e-06  ;;  %v31_v4 = vmax.f32 %v29_v2, 1e-06 }
   0x7   :  { %v32_v5 = vmul.f32 %v30_v3, %v30_v3  ;;  %v33_v6 = vmul.f32 %v31_v4, %v31_v4 }
   0x9   :  { %v34_v7 = vmul.f32 %v32_v5, %v30_v3  ;;  %v35_v8 = vmul.f32 %v33_v6, %v31_v4 }
   0xb   :  { %v37_v9 = vadd.f32 %v35_v8, %v34_v7 }
   0xc   :  { %v36_v10 = vld [vmem:[#allocation2] sm:$0xff] }
   0xd   :  { %38 = vadd.xlane.f32.xlu0 %v37_v9 }
  0x80   :  { %v39_v11 = vpop.xlane.xlu0 %38 }
  0x81   :  { %v40_v12 = vadd.f32 %v39_v11, %v36_v10 }
  0x83   :  { %42 = vst.msk [vmem:[#allocation2] sm:$0xff] %vm26_vm0, %v40_v12 }
  0x8a   :  { %v46_v13 = vld [vmem:[#allocation2] sm:$0xff] }
  0x8b   :  { %v47_v14 = vmul.f32 0.00390625, %v46_v13 }
  0x8d   :  { %61 = vlog2.f32 %v47_v14 }
  0x93   :  { %v62_v15 = vpop.eup %61 }
  0x94   :  { %v49_v16 = vmul.f32 0.6931472, %v62_v15 }
  0x96   :  { %v50_v17 = vmul.f32 0.33333334, %v49_v16 }
  0x98   :  { %v51_v18 = vmul.f32 1.442695, %v50_v17 }
  0x9a   :  { %63 = vpow2.f32 %v51_v18 }
  0xa0   :  { %v64_v19 = vpop.eup %63 }
  0xa1   :  { %53 = vst.msk [vmem:[%s113_s1] sm:$0xff] %vm26_vm0, %v64_v19 }
  0xa2   :  { %58 = vsyncpa [#allocation4], 1 }

</bundles_post_ra>
